<compile_context>
chip_gen: v7x
topology: tpu7x:2x2x1
jax: 0.10.0
libtpu: 0.0.40
codegen_flags: <defaults>
</compile_context>

<pallas_src>
import jax
import jax.numpy as jnp
from jax import lax
from jax.experimental import pallas as pl
from jax.experimental.pallas import tpu as pltpu

EPS = 1e-5  # PyTorch nn.LayerNorm default eps


# ---------------------------------------------------------------------------
# In-kernel math helpers
# ---------------------------------------------------------------------------
def _gelu(x):
    # exact (erf-based) GELU == torch.nn.GELU() default
    return 0.5 * x * (1.0 + lax.erf(x * 0.7071067811865476))


def _layernorm(x, g, b):
    mu = jnp.mean(x, axis=-1, keepdims=True)
    var = jnp.mean((x - mu) ** 2, axis=-1, keepdims=True)
    return (x - mu) * lax.rsqrt(var + EPS) * g + b


# ---------------------------------------------------------------------------
# Hardware / feature probes
# ---------------------------------------------------------------------------
_VMEM_CAP_CACHE = None
_BUFFERED_OK_CACHE = None
_BUFFERED_PROBE_ERROR = None  # kept for inspection (why fast path was disabled)


def _vmem_capacity_bytes():
    global _VMEM_CAP_CACHE
    if _VMEM_CAP_CACHE is None:
        try:
            _VMEM_CAP_CACHE = int(pltpu.get_tpu_info().vmem_capacity_bytes)
        except Exception:
            # Conservative (v7x-sized) fallback: safe on every generation.
            _VMEM_CAP_CACHE = 64 * 1024 * 1024
    return _VMEM_CAP_CACHE


def _vmem_limit_bytes():
    cap = _vmem_capacity_bytes()
    if cap >= 128 * 1024 * 1024:          # v5e / v6e: 128 MiB physical
        return 100 * 1024 * 1024
    # v7x (64 MiB) or unknown: leave headroom for compiler scratch
    return max(32 * 1024 * 1024, min(48 * 1024 * 1024, cap - 16 * 1024 * 1024))


def _buffered_weights_ok():
    """Probe once whether pipeline_mode=pl.Buffered(1) is supported."""
    global _BUFFERED_OK_CACHE, _BUFFERED_PROBE_ERROR
    if _BUFFERED_OK_CACHE is None:
        try:
            def _k(a_ref, w_ref, o_ref):
                o_ref[...] = a_ref[...] + w_ref[...]

            z = jnp.zeros((8, 128), jnp.float32)
            r = pl.pallas_call(
                _k,
                out_shape=jax.ShapeDtypeStruct((8, 128), jnp.float32),
                grid=(1,),
                in_specs=[pl.BlockSpec((8, 128), lambda i: (0, 0)),
                          pl.BlockSpec((8, 128), lambda i: (0, 0),
                                       pipeline_mode=pl.Buffered(1))],
                out_specs=pl.BlockSpec((8, 128), lambda i: (0, 0)),
            )(z, z)
            jax.block_until_ready(r)
            _BUFFERED_OK_CACHE = True
        except Exception as e:            # fall back, but remember why
            _BUFFERED_OK_CACHE = False
            _BUFFERED_PROBE_ERROR = repr(e)
    return _BUFFERED_OK_CACHE


# ---------------------------------------------------------------------------
# Pallas kernels
# ---------------------------------------------------------------------------
def _stem_kernel(p_ref, w_ref, o_ref):
    # patch-embedding conv == matmul of flattened patches with flattened kernel
    # (patches stay f32 in HBM; cast to bf16 in-kernel so HBM is read once).
    o_ref[...] = jnp.dot(p_ref[...].astype(jnp.bfloat16), w_ref[...],
                         preferred_element_type=jnp.float32)


def _mixer_kernel(x_ref, ln0g_ref, ln0b_ref, tw0_ref, tb0_ref, tw1_ref, tb1_ref,
                  ln1g_ref, ln1b_ref, cw0_ref, cb0_ref, cw1_ref, cb1_ref, o_ref):
    bb, T, C = x_ref.shape
    Dt = tw0_ref.shape[0]
    Dc = cw0_ref.shape[1]

    # Grid-invariant params: read once per grid step.
    ln0g, ln0b = ln0g_ref[...], ln0b_ref[...]
    ln1g, ln1b = ln1g_ref[...], ln1b_ref[...]
    tw0, tw1 = tw0_ref[...], tw1_ref[...]          # (Dt, T), (T, Dt) bf16
    cw0, cw1 = cw0_ref[...], cw1_ref[...]          # (C, Dc), (Dc, C) bf16
    # Hoist bias broadcasts out of the per-image loop (JAX does not CSE them).
    tb0 = jnp.broadcast_to(tb0_ref[...], (Dt, C))
    tb1 = jnp.broadcast_to(tb1_ref[...], (T, C))
    cb0 = jnp.broadcast_to(cb0_ref[...], (T, Dc))
    cb1 = jnp.broadcast_to(cb1_ref[...], (T, C))

    def one_image(b):
        x = x_ref[b]                                             # (T, C) f32, free leading-dim index
        # ---- token mixing -------------------------------------------------
        y = _layernorm(x, ln0g, ln0b).astype(jnp.bfloat16)        # (T, C)
        h = jnp.dot(tw0, y, preferred_element_type=jnp.float32)   # (Dt, C)
        h = _gelu(h + tb0).astype(jnp.bfloat16)
        x = x + jnp.dot(tw1, h, preferred_element_type=jnp.float32) + tb1  # (T, C)
        # ---- channel mixing -----------------------------------------------
        y = _layernorm(x, ln1g, ln1b).astype(jnp.bfloat16)        # (T, C)
        h = jnp.dot(y, cw0, preferred_element_type=jnp.float32) + cb0      # (T, Dc)
        h = _gelu(h).astype(jnp.bfloat16)
        o_ref[b] = x + jnp.dot(h, cw1, preferred_element_type=jnp.float32) + cb1

    if bb == 1:
        one_image(0)
    else:
        def body(b, carry):
            one_image(b)
            return carry
        lax.fori_loop(0, bb, body, None)


def _head_kernel(x_ref, lng_ref, lnb_ref, fcw_ref, fcb_ref, o_ref):
    y = _layernorm(x_ref[...], lng_ref[...], lnb_ref[...])        # (bb, T, C)
    pooled = jnp.mean(y, axis=1)                                  # (bb, C)
    o_ref[...] = (jnp.dot(pooled.astype(jnp.bfloat16), fcw_ref[...],
                          preferred_element_type=jnp.float32) + fcb_ref[...])


# ---------------------------------------------------------------------------
# Tile-size selection (VMEM-budget + megacore aware)
# ---------------------------------------------------------------------------
def _pick_row_tile(M, max_tile):
    """Largest multiple-of-8 divisor of M <= max_tile, preferring >= 2 grid steps."""
    best_multi, best_any = None, None
    t = 8
    while t <= min(M, max_tile):
        if M % t == 0:
            best_any = t
            if M // t >= 2:
                best_multi = t
        t += 8
    if best_multi is not None:
        return best_multi
    if best_any is not None:
        return best_any
    return M


def _mixer_step_bytes(bb, T, C, Dt, Dc, weight_bytes):
    act_pipeline = 4 * bb * T * C * 4            # in + out blocks, double-buffered f32
    per_image = (6 * T * C * 4                    # residual / LN / bias f32 temporaries
                 + 2 * T * C * 2                  # bf16 LN outputs
                 + (Dt * C + T * Dc) * (4 + 2 + 4))  # MLP hiddens: f32 + bf16 + bias bcast
    return act_pipeline + per_image + weight_bytes


def _pick_batch_tile(B, T, C, Dt, Dc, weight_bytes, budget):
    best = 1
    for bb in range(1, B + 1):
        if B % bb:
            continue
        if B >= 2 and B // bb < 2:   # keep >= 2 grid steps so both v7x TCs get work
            continue
        if _mixer_step_bytes(bb, T, C, Dt, Dc, weight_bytes) <= budget:
            best = bb
    return best


def _pick_head_tile(B, T, C, budget):
    cands = []
    for b in range(1, B + 1):
        if B % b:
            continue
        if not (b % 8 == 0 or b == B):   # keep output (bb, N) block legal, no padded rows
            continue
        if 4 * b * T * C * 4 <= budget:
            cands.append(b)
    if not cands:
        return B
    multi = [b for b in cands if B // b >= 2]
    return max(multi) if multi else max(cands)


# ---------------------------------------------------------------------------
# Wrappers (pallas_call plumbing)
# ---------------------------------------------------------------------------
def stem_matmul(patches, w2d, *, vmem_limit):
    """(M, K) x (K, C) patch-embedding matmul, tiled over M."""
    M, K = patches.shape
    C = w2d.shape[1]
    max_tile = 1024 if vmem_limit >= 80 * 1024 * 1024 else 512
    tile_m = _pick_row_tile(M, max_tile)
    grid = (M // tile_m,)
    return pl.pallas_call(
        _stem_kernel,
        out_shape=jax.ShapeDtypeStruct((M, C), jnp.float32),
        grid=grid,
        in_specs=[pl.BlockSpec((tile_m, K), lambda i: (i, 0)),
                  pl.BlockSpec((K, C), lambda i: (0, 0))],   # resident weight
        out_specs=pl.BlockSpec((tile_m, C), lambda i: (i, 0)),
        compiler_params=pltpu.CompilerParams(
            dimension_semantics=("parallel",),
            vmem_limit_bytes=int(vmem_limit)),
    )(patches, w2d)


def mixer_block(x3d, block_params, *, buffered_ok, vmem_limit):
    """One MixerBlock on the (B, T, C) token slab (updated in place in HBM)."""
    B, T, C = x3d.shape
    Dt = block_params[2].shape[0]     # tw0: (Dt, T)
    Dc = block_params[8].shape[1]     # cw0: (C, Dc)
    w_mult = 1 if buffered_ok else 2  # non-buffered weights get double-buffered
    weight_bytes = w_mult * sum(int(p.size) * p.dtype.itemsize for p in block_params)
    bb = _pick_batch_tile(B, T, C, Dt, Dc, weight_bytes, int(vmem_limit * 0.85))
    grid = (B // bb,)

    def wspec(p):
        kw = {"pipeline_mode": pl.Buffered(1)} if buffered_ok else {}
        return pl.BlockSpec(p.shape, lambda i, _n=p.ndim: (0,) * _n, **kw)

    # TODO(synk): on v5e, optionally carry the inter-block residual in bf16 or
    # fuse two MixerBlocks per pallas_call to halve HBM round-trips.
    return pl.pallas_call(
        _mixer_kernel,
        out_shape=jax.ShapeDtypeStruct((B, T, C), jnp.float32),
        grid=grid,
        in_specs=[pl.BlockSpec((bb, T, C), lambda i: (i, 0, 0))]
                 + [wspec(p) for p in block_params],
        out_specs=pl.BlockSpec((bb, T, C), lambda i: (i, 0, 0)),
        input_output_aliases={0: 0},      # residual stream updated in place
        compiler_params=pltpu.CompilerParams(
            dimension_semantics=("parallel",),
            vmem_limit_bytes=int(vmem_limit)),
    )(x3d, *block_params)


def head(x3d, ln_g, ln_b, fc_w, fc_b, *, vmem_limit):
    """Final LayerNorm + token-mean pool + classifier, tiled over batch."""
    B, T, C = x3d.shape
    N = fc_w.shape[1]
    bb = _pick_head_tile(B, T, C, budget=max(vmem_limit // 4, 8 * 1024 * 1024))
    grid = (B // bb,)
    return pl.pallas_call(
        _head_kernel,
        out_shape=jax.ShapeDtypeStruct((B, N), jnp.float32),
        grid=grid,
        in_specs=[pl.BlockSpec((bb, T, C), lambda i: (i, 0, 0)),
                  pl.BlockSpec((1, C), lambda i: (0, 0)),
                  pl.BlockSpec((1, C), lambda i: (0, 0)),
                  pl.BlockSpec((C, N), lambda i: (0, 0)),
                  pl.BlockSpec((1, N), lambda i: (0, 0))],
        out_specs=pl.BlockSpec((bb, N), lambda i: (i, 0)),
        compiler_params=pltpu.CompilerParams(
            dimension_semantics=("parallel",),
            vmem_limit_bytes=int(vmem_limit)),
    )(x3d, ln_g, ln_b, fc_w, fc_b)


# ---------------------------------------------------------------------------
# Full model forward (glue in plain JAX, hot paths in Pallas)
# ---------------------------------------------------------------------------
def mlp_mixer_forward(x, params):
    # layout: x is NCHW (B, 3, H, W)
    B, Cin, H, W = x.shape
    p = params["patch_size"]
    Hp, Wp = H // p, W // p
    T = Hp * Wp
    # extract non-overlapping patches -> (B*T, Cin*p*p); flatten order (Cin, ph, pw)
    patches = (x.reshape(B, Cin, Hp, p, Wp, p)
                .transpose(0, 2, 4, 1, 3, 5)
                .reshape(B * T, Cin * p * p))
    vmem_limit = _vmem_limit_bytes()
    tok = stem_matmul(patches, params["stem_w"], vmem_limit=vmem_limit)   # (B*T, C)
    C = tok.shape[1]
    tok = tok.reshape(B, T, C)                    # token slab, channel dim on lanes
    buffered_ok = _buffered_weights_ok()
    for blk in params["blocks"]:
        tok = mixer_block(tok, blk, buffered_ok=buffered_ok, vmem_limit=vmem_limit)
    return head(tok, params["ln_g"], params["ln_b"], params["fc_w"], params["fc_b"],
                vmem_limit=vmem_limit)


# ---------------------------------------------------------------------------
# Deterministic parameter initialization (synthetic; shapes from __init__)
# ---------------------------------------------------------------------------
def init_params(key, *, num_classes, num_blocks, patch_size, hidden_dim,
                tokens_mlp_dim, channels_mlp_dim, image_size):
    num_tokens = (image_size // patch_size) ** 2
    K = 3 * patch_size * patch_size
    bf16 = jnp.bfloat16

    def dense(k, din, dout):
        kw, kb = jax.random.split(k)
        w = 0.02 * jax.random.normal(kw, (din, dout), jnp.float32)
        b = 0.01 * jax.random.normal(kb, (1, dout), jnp.float32)
        return w, b

    def lnorm(k, d):
        kg, kb = jax.random.split(k)
        g = 1.0 + 0.02 * jax.random.normal(kg, (1, d), jnp.float32)
        b = 0.01 * jax.random.normal(kb, (1, d), jnp.float32)
        return g, b

    keys = jax.random.split(key, 3 + num_blocks)
    stem_w = (0.02 * jax.random.normal(keys[0], (K, hidden_dim),
                                       jnp.float32)).astype(bf16)

    blocks = []
    for i in range(num_blocks):
        k = jax.random.split(keys[3 + i], 6)
        ln0g, ln0b = lnorm(k[0], hidden_dim)
        tw0, tb0 = dense(k[1], num_tokens, tokens_mlp_dim)     # (T, Dt), (1, Dt)
        tw1, tb1 = dense(k[2], tokens_mlp_dim, num_tokens)     # (Dt, T), (1, T)
        ln1g, ln1b = lnorm(k[3], hidden_dim)
        cw0, cb0 = dense(k[4], hidden_dim, channels_mlp_dim)
        cw1, cb1 = dense(k[5], channels_mlp_dim, hidden_dim)
        blocks.append((ln0g, ln0b,
                       tw0.T.astype(bf16), tb0.T,   # (Dt, T) bf16, (Dt, 1) f32
                       tw1.T.astype(bf16), tb1.T,   # (T, Dt) bf16, (T, 1)  f32
                       ln1g, ln1b,
                       cw0.astype(bf16), cb0,
                       cw1.astype(bf16), cb1))

    ln_g, ln_b = lnorm(keys[1], hidden_dim)
    fc_w, fc_b = dense(keys[2], hidden_dim, num_classes)

    return {"patch_size": patch_size, "num_tokens": num_tokens,
            "stem_w": stem_w, "blocks": blocks,
            "ln_g": ln_g, "ln_b": ln_b,
            "fc_w": fc_w.astype(bf16), "fc_b": fc_b}


# ---------------------------------------------------------------------------
# Pure-JAX reference (f32 math, bf16-rounded weights) for validation
# ---------------------------------------------------------------------------
def reference_forward(x, params):
    B, Cin, H, W = x.shape
    p = params["patch_size"]
    Hp, Wp = H // p, W // p
    f32 = jnp.float32

    def ln(v, g, b):
        mu = v.mean(-1, keepdims=True)
        var = ((v - mu) ** 2).mean(-1, keepdims=True)
        return (v - mu) / jnp.sqrt(var + EPS) * g[0] + b[0]

    def gelu(v):
        return 0.5 * v * (1.0 + lax.erf(v / jnp.sqrt(2.0)))

    patches = (x.reshape(B, Cin, Hp, p, Wp, p)
                .transpose(0, 2, 4, 1, 3, 5)
                .reshape(B, Hp * Wp, Cin * p * p))
    t = patches @ params["stem_w"].astype(f32)
    for (ln0g, ln0b, tw0t, tb0, tw1t, tb1,
         ln1g, ln1b, cw0, cb0, cw1, cb1) in params["blocks"]:
        y = ln(t, ln0g, ln0b).transpose(0, 2, 1)                  # (B, C, T)
        y = (gelu(y @ tw0t.astype(f32).T + tb0[:, 0])
             @ tw1t.astype(f32).T + tb1[:, 0])                    # (B, C, T)
        t = t + y.transpose(0, 2, 1)
        y = ln(t, ln1g, ln1b)
        t = t + (gelu(y @ cw0.astype(f32) + cb0[0]) @ cw1.astype(f32) + cb1[0])
    y = ln(t, params["ln_g"], params["ln_b"]).mean(axis=1)
    return y @ params["fc_w"].astype(f32) + params["fc_b"][0]


# ---------------------------------------------------------------------------
if __name__ == "__main__":
    # small but representative config
    num_classes, num_blocks = 10, 2
    patch_size, hidden_dim = 4, 32
    tokens_mlp_dim, channels_mlp_dim = 64, 128
    image_size, batch = 16, 2            # -> num_tokens = (16/4)^2 = 16

    key = jax.random.PRNGKey(0)
    kx, kp = jax.random.split(key)
    x = jax.random.normal(kx, (batch, 3, image_size, image_size), jnp.float32)
    params = init_params(kp, num_classes=num_classes, num_blocks=num_blocks,
                         patch_size=patch_size, hidden_dim=hidden_dim,
                         tokens_mlp_dim=tokens_mlp_dim,
                         channels_mlp_dim=channels_mlp_dim,
                         image_size=image_size)

    out = mlp_mixer_forward(x, params)
    out = jax.block_until_ready(out)

    ref = reference_forward(x, params)
    assert out.shape == (batch, num_classes)
    err = float(jnp.max(jnp.abs(out - ref)))
    # bf16 MXU operands (f32 accumulation) vs the f32 reference
    assert jnp.allclose(out, ref, atol=1e-2, rtol=1e-2), \
        f"mismatch vs reference (max abs err {err})"

    print("KERNEL_OK")
</pallas_src>

<mosaic_0001>
module attributes {stable_mosaic.version = 11 : i64} {
  func.func @_stem_kernel(%arg0: i32, %arg1: memref<16x48xf32, #tpu.memory_space<vmem>>, %arg2: memref<48x32xbf16, #tpu.memory_space<vmem>>, %arg3: memref<16x32xf32, #tpu.memory_space<vmem>>) attributes {dimension_semantics = [#tpu.dimension_semantics<parallel>], iteration_bounds = array<i64: 2>, scalar_prefetch = 0 : i64, scratch_operands = 0 : i64, tpu.core_type = #tpu.core_type<tc>, window_params = [{transform_indices = @transform_0, window_bounds = array<i64: 16, 48>}, {pipeline_mode = #tpu.pipeline_mode<synchronous>, transform_indices = @transform_1, window_bounds = array<i64: 48, 32>}, {transform_indices = @transform_2, window_bounds = array<i64: 16, 32>}]} {
    %c0 = arith.constant 0 : index
    %c0_0 = arith.constant 0 : index
    %0 = vector.load %arg1[%c0, %c0_0] : memref<16x48xf32, #tpu.memory_space<vmem>>, vector<16x48xf32>
    %1 = arith.truncf %0 : vector<16x48xf32> to vector<16x48xbf16>
    %c0_1 = arith.constant 0 : index
    %c0_2 = arith.constant 0 : index
    %2 = vector.load %arg2[%c0_1, %c0_2] : memref<48x32xbf16, #tpu.memory_space<vmem>>, vector<48x32xbf16>
    %cst = arith.constant dense<0.000000e+00> : vector<16x32xf32>
    %3 = tpu.matmul %1, %2, %cst {dimension_numbers = #tpu.dot_dimension_numbers<[1], [0], [0], [1], [0, 0, 1, 1], [], []>} : vector<16x48xbf16>, vector<48x32xbf16>, vector<16x32xf32> -> vector<16x32xf32>
    %c0_3 = arith.constant 0 : index
    %c0_4 = arith.constant 0 : index
    %4 = vector.load %arg3[%c0_3, %c0_4] : memref<16x32xf32, #tpu.memory_space<vmem>>, vector<16x32xf32>
    tpu.vector_store %arg3[%c0_3, %c0_4], %3 {strides = array<i32>} : memref<16x32xf32, #tpu.memory_space<vmem>>, vector<16x32xf32>,
    return
  }
  func.func @transform_0(%arg0: i32) -> (i32, i32) {
    %c0_i32 = arith.constant 0 : i32
    %c0_i32_0 = arith.constant 0 : i32
    return %arg0, %c0_i32 : i32, i32
  }
  func.func @transform_1(%arg0: i32) -> (i32, i32) {
    %c0_i32 = arith.constant 0 : i32
    %c0_i32_0 = arith.constant 0 : i32
    %c0_i32_1 = arith.constant 0 : i32
    return %c0_i32, %c0_i32_0 : i32, i32
  }
  func.func @transform_2(%arg0: i32) -> (i32, i32) {
    %c0_i32 = arith.constant 0 : i32
    %c0_i32_0 = arith.constant 0 : i32
    return %arg0, %c0_i32 : i32, i32
  }
}

</mosaic_0001>

<bundles_post_ra>
// kernel: tpu_custom_call.1
= control target key start
LH: loop header
LB: loop body
LE: loop exit
PB: predicated region body
PF: predicated region fallthrough
CT: control target
= control target key end

     0   :  { %7 = vsyncpa [#allocation3], 0  ;;  %s569_s0 = inlined_call_operand.vmem [shape: f32[32,48], index: 0, kind: input, shape index: {}]   ;;  %s570_s1 = inlined_call_operand.vmem [shape: bf16[48,32], index: 1, kind: input, shape index: {}]   ;;  %s571_s2 = inlined_call_operand.hbm [shape: f32[32,32], index: 2, kind: output, shape index: {}]  }
   0x1   :  { %9 = vsyncpa [#allocation3 + $0x1], 0  ;;  %s458_s9 = smov 0   ;;  %s460_s10 = smov 0  }
   0x2   :  { %s462_s11 = smov 0   ;;  %s464_s12 = smov 0  }
   0x3 LB: > { %s479_s13 = sadd.s32 4294967295, %s436_s12   ;;  %s297_s14 = sadd.s32 4294967294, %s436_s12   ;;  %s436_s12 = sphi %s464_s12, %s577_s12   ;;  %s432_s11 = sphi %s462_s11, %s576_s11   ;;  %s428_s10 = sphi %s460_s10, %s575_s10   ;;  %s424_s9 = sphi %s458_s9, %s574_s9  }
   0x4   : > { %s483_s15 = sadd.s32 1, %s436_s12   ;;  %s69_s16 = sadd.s32 1, %s432_s11 }
   0x5   : > { %s66_s17 = ssub.s32 %s436_s12, %s483_s15  ;;  %p79_p0 = scmp.ne.s32.totalorder %s432_s11, %s428_s10 }
   0x6   : > { %p67_p1 = scmp.eq.s32.totalorder %s66_s17, 0  ;;  %p80_p2 = scmp.eq.s32.totalorder %s479_s13, 1 }
   0x7   : > { %p85_p3 = scmp.ne.s32.totalorder %s428_s10, %s424_s9  ;;  %p86_p4 = scmp.eq.s32.totalorder %s297_s14, 1 }
   0x8   : > { %s494_s18 = scalar_select %p67_p1, %s432_s11, %s69_s16  }
   0x9   : > { %p496_p5 = por %p80_p2, %p79_p0  ;;  %p500_p6 = por %p86_p4, %p85_p3 }
   0xa   : > { %p300_p7 = scmp.ge.s32.totalorder %s436_s12, 1  ;;  %p116_p8 = scmp.lt.s32.totalorder %s436_s12, 3 }
   0xc   : > { %p117_p9 = pnand %p300_p7, %p116_p8 }
   0xd   : > { %v371_v0 = vld [vmem:[%s570_s1] sm:$0xff] (!%p117_p9)   ;;  %v438_v1 = vmov (!%p117_p9), 0.0   ;;  %v372_v2 = vld [vmem:[%s570_s1 + $0x8] sm:$0xff] (!%p117_p9)   ;;  %vm439_vm0 = vmmov (!%p117_p9), 0   ;;  %s302_s25 = sshll.u32 (!%p117_p9), %s479_s13, 1  ;;  %v373_v3 = vld [vmem:[%s570_s1 + $0x10] sm:$0xff] (!%p117_p9)  }
   0xe   : > { %120 = sbr.rel (%p117_p9) target bundleno = 256 (0x100), region = 28  ;;  %318 = vmatprep.subr.bf16.mxu0 (!%p117_p9), %v438_v1  ;;  %324 = vmatprep.mubr.msk.bf16.mxu0 (!%p117_p9), %vm439_vm0, %v438_v1  ;;  %p139_p10 = scmp.lt.s32.totalorder (!%p117_p9), %s302_s25, 3  ;;  %vm173_vm1 = vcmask (!%p117_p9), 392192   ;;  %vm218_vm2 = vcmask (!%p117_p9), 261120  }
   0xf   : > { %319 = vmatpush3.bf16.msra.mxu0 (!%p117_p9), %v371_v0  ;;  %s135_s4 = sand.u32 (!%p117_p9), 1, %s428_s10   ;;  %s313_s8 = sshll.u32 (!%p117_p9), %s479_s13, 8 }
  0x10   : > { %320 = vmatprep.subr.bf16.mxu0 (!%p117_p9), %v438_v1  ;;  %s301_s5 = sshll.u32 (!%p117_p9), %s135_s4, 4  ;;  %s526_s17 = scalar_lea.hbm (!%p117_p9), %s571_s2, %s313_s8 }
  0x11   : > { %s137_s6 = scalar_lea.vmem (!%p117_p9), [#allocation2], %s301_s5  ;;  %s528_s21 = scalar_lea.sflag (!%p117_p9), [#allocation3], %s135_s4 }
  0x12   : > { %s235_s7 = sshll.u32 (!%p117_p9), %s137_s6, 4  ;;  %s440_s22 = smov (!%p117_p9), [#allocation2]   ;;  %s521_s7 = int_to_ptr.vmem [resolvable:$true] %s235_s7 }
  0x13   : > { %321 = vmatpush3.bf16.msra.mxu0 (!%p117_p9), %v372_v2  ;;  %s374_s13 = scalar_lea.vmem (!%p117_p9), %s521_s7, 256  ;;  %s378_s23 = sshll.u32 (!%p117_p9), %s440_s22, 4  ;;  %s379_s23 = int_to_ptr.vmem [resolvable:$false] %s378_s23 }
  0x14   : > { %322 = vmatprep.subr.bf16.mxu0 (!%p117_p9), %v438_v1  ;;  %p375_p11 = scmp.ne.s32.totalorder (!%p117_p9), %s521_s7, %s374_s13  ;;  %s380_s24 = scalar_lea.vmem (!%p117_p9), %s379_s23, 512 }
  0x15   : > { %s579_s25 = smov (!%p139_p10, %s302_s25), 3  ;;  %p381_p0 = scmp.lt.s32.totalorder %s521_s7, %s379_s23 }
  0x16   : > { %s303_s28 = sshll.u32 %s579_s25, 3  ;;  %p376_p12 = pnand %p375_p11, %p496_p5 }
  0x17   : > { %s142_s3 = scalar_lea.vmem %s569_s0, %s303_s28  ;;  %323 = vmatpush3.bf16.msra.mxu0 %v373_v3  ;;  %p382_p1 = scmp.lt.s32.totalorder %s380_s24, %s374_s13 }
  0x18   : > { %v146_v4 = vld [vmem:[%s142_s3] sm:$0xff]  ;;  %v147_v5 = vld [vmem:[%s142_s3 + $0x8] sm:$0xff]  ;;  %p377_p13 = pneg %p376_p12 }
  0x19   : > { %v148_v6 = vpack.c.bf16 %v147_v5, %v146_v4  ;;  %p383_p2 = por %p382_p1, %p381_p0 }
  0x1b   : > { %325 = vmatmul.mubr.msk.bf16.vlgmr.msra.gmra.mrb[0].mxu0 %vm173_vm1, %v148_v6  ;;  %p384_p3 = pnand %p383_p2, %p377_p13 }
  0xee   : > { %v211_v7 = vpop.f32.mrb[0].mxu0 }
  0xef   : > { %219 = vst.msk [vmem:[%s137_s6] sm:$0xff] %vm218_vm2, %v211_v7  ;;  %v326_v8 = vpop.f32.mrb[1].mxu0 }
  0xf0   : > { %v214_v9 = vpop.f32.mrb[2].mxu0 }
  0xf1   : > { %220 = vst.msk [vmem:[%s137_s6 + $0x8] sm:$0xff] %vm218_vm2, %v214_v9  ;;  %v327_v10 = vpop.f32.mrb[3].mxu0 }
  0xf2   : > { %387 = shalt.err (!%p384_p3)
}
  0xf3   : > { %s388_s25 = scalar_lea.hbm %s526_s17, 256  ;;  %s392_s28 = scalar_lea.hbm %s571_s2, 512 }
  0xf4   : > { %p389_p4 = scmp.ne.s32.totalorder %s526_s17, %s388_s25  ;;  %p393_p9 = scmp.lt.u32.totalorder %s526_s17, %s571_s2 }
  0xf5   : > { %p394_p10 = scmp.lt.u32.totalorder %s392_s28, %s388_s25  ;;  %p396_p12 = scmp.lt.u32.totalorder %s388_s25, %s526_s17 }
  0xf6   : > { %p390_p7 = pnand %p389_p4, %p496_p5 }
  0xf7   : > { %p395_p11 = por %p394_p10, %p393_p9 }
  0xf8   : > { %p391_p8 = pneg %p390_p7 }
  0xf9   : > { %p397_p13 = por %p396_p12, %p395_p11 }
  0xfb   : > { %p398_p0 = pnand %p397_p13, %p391_p8 }
  0xfd   : > { %401 = shalt.err (!%p398_p0)
}
  0xfe   : > { %s441_s3 = smov 128   ;;  %s442_s4 = smov 8  }
  0xff   : > { %328 = dma.vmem_to_hbm [thread:$0]  (%p496_p5), %s521_s7, 256, %s526_s17, %s528_s21, %s441_s3, %s441_s3, %s442_s4  }
 0x100 PF: > { %p334_p1 = scmp.ge.s32.totalorder %s436_s12, 2  ;;  %s250_s5 = sand.u32 1, %s424_s9  }
 0x101   : > { %s251_s6 = scalar_lea.sflag [#allocation3], %s250_s5 }
 0x102   : > { %p331_p2 = pnand %p334_p1, %p500_p6 }
 0x104   : > { %419 = dma.done.wait (!%p331_p2), %s251_s6, 256  }
 0x105   : > { %421 = vsyncadd (!%p331_p2), %s251_s6, 4294967040  ;;  %p12_p3 = scmp.ge.s32.totalorder %s483_s15, 4   ;;  %s574_s9 = smov %s428_s10 }
 0x106   : > { %s575_s10 = smov %s432_s11  ;;  %s576_s11 = smov %s494_s18 }
 0x107   : > { %s577_s12 = smov %s483_s15  ;;  %14 = sbr.rel (!%p12_p3) target bundleno = 3 (0x3), region = 63 }
 0x10e   :  { %256 = vsyncpa [#allocation3], 1 }
 0x10f   :  { %258 = vsyncpa [#allocation3 + $0x1], 1 }

</bundles_post_ra>
